<compile_context>
chip_gen: v7x
topology: tpu7x:2x2x1
jax: 0.10.0
libtpu: 0.0.40
codegen_flags: <defaults>
</compile_context>

<pallas_src>
import functools

import jax
import jax.numpy as jnp
from jax import lax
from jax.experimental import pallas as pl
from jax.experimental.pallas import tpu as pltpu


def _round_up(x, m):
    return (x + m - 1) // m * m


# ----------------------------------------------------------------------------
# Pallas kernel: one fused TemporalBlock for one (batch, time-tile) grid cell.
#   conv1 -> ReLU -> conv2 -> ReLU -> (+ residual / 1x1 downsample) -> ReLU
# ----------------------------------------------------------------------------
def _temporal_block_kernel(xc_ref, xp_ref, w1_ref, b1_ref, w2_ref, b2_ref,
                           *rest, dilation, ksize, has_downsample, time_tile):
    if has_downsample:
        wd_ref, bd_ref, o_ref = rest
    else:
        (o_ref,) = rest

    t = pl.program_id(1)
    TL = time_tile
    d = dilation
    K = ksize
    hc = (K - 1) * d          # causal history needed by one conv
    H = 2 * hc                # history of x needed by the fused two-conv block

    x_cur = xc_ref[0]         # (Cin_p, TL), compute dtype
    cdt = x_cur.dtype

    # ---- stitch left halo of x from the previous time tile (zeros at t==0) ----
    if H > 0:
        hist = xp_ref[0][:, TL - H:TL]                       # (Cin_p, H)
        hist = jnp.where(t == 0, jnp.zeros_like(hist), hist)
        x_ext = jnp.concatenate([hist, x_cur], axis=-1)      # (Cin_p, TL + H)
    else:
        x_ext = x_cur

    # ---- conv1 (causal, dilated): single stacked-tap MXU matmul ----
    # produce TL + hc output columns so conv2 has its own h1 history
    L1 = TL + hc
    if K > 1:
        x_taps = jnp.concatenate(
            [x_ext[:, j * d: j * d + L1] for j in range(K)], axis=0)
    else:
        x_taps = x_ext                                       # (K*Cin_p, L1)
    h1 = jnp.dot(w1_ref[...], x_taps, preferred_element_type=jnp.float32)
    h1 = jnp.maximum(h1 + b1_ref[...], 0.0)                  # (Cout_p, L1) f32
    if hc > 0:
        # h1 at negative global time must be 0 (conv2's zero padding), not relu(b1)
        col = lax.broadcasted_iota(jnp.int32, h1.shape, 1)
        h1 = jnp.where(jnp.logical_and(t == 0, col < hc), 0.0, h1)
    h1 = h1.astype(cdt)

    # ---- conv2 (causal, dilated) over the TL output columns ----
    if K > 1:
        h1_taps = jnp.concatenate(
            [h1[:, j * d: j * d + TL] for j in range(K)], axis=0)
    else:
        h1_taps = h1                                         # (K*Cout_p, TL)
    h2 = jnp.dot(w2_ref[...], h1_taps, preferred_element_type=jnp.float32)
    h2 = jnp.maximum(h2 + b2_ref[...], 0.0)                  # (Cout_p, TL) f32

    # ---- residual (identity or 1x1 downsample conv) + final ReLU ----
    if has_downsample:
        res = jnp.dot(wd_ref[...], x_cur,
                      preferred_element_type=jnp.float32) + bd_ref[...]
    else:
        res = x_cur.astype(jnp.float32)

    o_ref[0] = jnp.maximum(h2 + res, 0.0).astype(o_ref.dtype)


# ----------------------------------------------------------------------------
# Wrapper for one TemporalBlock (one pallas_call, grid over (batch, time-tiles)).
# ----------------------------------------------------------------------------
def temporal_block(x_ncl, params, *, dilation, ksize, time_tile):
    N, Cin_p, Lp = x_ncl.shape
    w1, b1 = params["w1s"], params["b1c"]
    w2, b2 = params["w2s"], params["b2c"]
    Cout_p = w1.shape[0]
    has_ds = "wds" in params
    TL = time_tile
    assert Lp % TL == 0 and TL >= 2 * (ksize - 1) * dilation
    num_t = Lp // TL

    def rep_spec(arr):
        shp = arr.shape
        return pl.BlockSpec(shp, lambda n, t, _r=len(shp): (0,) * _r)

    in_specs = [
        # current time tile
        pl.BlockSpec((1, Cin_p, TL), lambda n, t: (n, 0, t)),
        # previous time tile of the same array (causal halo source)
        pl.BlockSpec((1, Cin_p, TL), lambda n, t: (n, 0, jnp.maximum(t - 1, 0))),
        rep_spec(w1), rep_spec(b1), rep_spec(w2), rep_spec(b2),
    ]
    inputs = [x_ncl, x_ncl, w1, b1, w2, b2]
    if has_ds:
        in_specs += [rep_spec(params["wds"]), rep_spec(params["bdc"])]
        inputs += [params["wds"], params["bdc"]]

    kernel = functools.partial(_temporal_block_kernel, dilation=dilation,
                               ksize=ksize, has_downsample=has_ds,
                               time_tile=TL)

    return pl.pallas_call(
        kernel,
        out_shape=jax.ShapeDtypeStruct((N, Cout_p, Lp), x_ncl.dtype),
        grid=(N, num_t),
        in_specs=in_specs,
        out_specs=pl.BlockSpec((1, Cout_p, TL), lambda n, t: (n, 0, t)),
        compiler_params=pltpu.CompilerParams(
            dimension_semantics=("parallel", "parallel"),
            vmem_limit_bytes=48 * 1024 * 1024),
    )(*inputs)


# ----------------------------------------------------------------------------
# Parameter preparation: fold torch-layout weights into stacked, padded,
# compute-dtype kernel weights.  (weight_norm already folded -> effective w.)
# ----------------------------------------------------------------------------
def prepare_block_params(p, ksize, compute_dtype):
    w1, w2 = p["w1"], p["w2"]              # (Cout, Cin, K) torch layout
    b1, b2 = p["b1"], p["b2"]
    Cout, Cin, K = w1.shape
    assert K == ksize
    Cin_p = _round_up(Cin, 8)
    Cout_p = _round_up(Cout, 8)

    def stack(w, cin_p):
        co, ci, k = w.shape
        wp = jnp.zeros((Cout_p, k, cin_p), jnp.float32)
        wp = wp.at[:co, :, :ci].set(jnp.transpose(w, (0, 2, 1)))
        return wp.reshape(Cout_p, k * cin_p).astype(compute_dtype)

    def pad_bias(b):
        return jnp.zeros((Cout_p, 1), jnp.float32).at[:Cout, 0].set(b)

    out = {
        "w1s": stack(w1, Cin_p), "b1c": pad_bias(b1),
        "w2s": stack(w2, Cout_p), "b2c": pad_bias(b2),
        "cin": Cin, "cout": Cout, "cin_p": Cin_p, "cout_p": Cout_p,
    }
    if "wd" in p:                           # 1x1 downsample conv
        wd = p["wd"][:, :, 0]
        out["wds"] = (jnp.zeros((Cout_p, Cin_p), jnp.float32)
                      .at[:Cout, :Cin].set(wd).astype(compute_dtype))
        out["bdc"] = pad_bias(p["bd"])
    return out


# ----------------------------------------------------------------------------
# TemporalConvNet: stack of TemporalBlocks (all in padded NCL layout).
# ----------------------------------------------------------------------------
def temporal_conv_net(x_ncl, prepared_params, ksize, *, time_tile=1024):
    N, C_in, L = x_ncl.shape
    num_levels = len(prepared_params)
    cdt = prepared_params[0]["w1s"].dtype
    hc_max = (ksize - 1) * (2 ** (num_levels - 1))

    # time tile: multiple of 128 (lane-dense), >= 2*halo, bounded by time_tile
    TL = max(min(time_tile, _round_up(L, 128)), _round_up(max(2 * hc_max, 1), 128))
    Lp = _round_up(L, TL)

    Cin_p = prepared_params[0]["cin_p"]
    # pad channels (sublane multiple of 8) and time (multiple of TL) once
    x = jnp.pad(x_ncl, ((0, 0), (0, Cin_p - C_in), (0, Lp - L))).astype(cdt)
    for i, p in enumerate(prepared_params):
        x = temporal_block(x, p, dilation=2 ** i, ksize=ksize, time_tile=TL)
    C_out = prepared_params[-1]["cout"]
    return x[:, :C_out, :L].astype(jnp.float32)


# ----------------------------------------------------------------------------
# Deterministic parameter init (torch layout, shapes as in the PyTorch module).
# ----------------------------------------------------------------------------
def init_params(key, num_inputs, num_channels, ksize):
    params = []
    for i, out_ch in enumerate(num_channels):
        in_ch = num_inputs if i == 0 else num_channels[i - 1]
        key, k1, k2, k3, k4, k5, k6 = jax.random.split(key, 7)
        p = {
            "w1": 0.01 * jax.random.normal(k1, (out_ch, in_ch, ksize), jnp.float32),
            "b1": 0.05 * jax.random.normal(k3, (out_ch,), jnp.float32),
            "w2": 0.01 * jax.random.normal(k2, (out_ch, out_ch, ksize), jnp.float32),
            "b2": 0.05 * jax.random.normal(k4, (out_ch,), jnp.float32),
        }
        if in_ch != out_ch:
            p["wd"] = 0.01 * jax.random.normal(k5, (out_ch, in_ch, 1), jnp.float32)
            p["bd"] = 0.05 * jax.random.normal(k6, (out_ch,), jnp.float32)
        params.append(p)
    return params


# ----------------------------------------------------------------------------
# Pure-JAX reference (mirrors PyTorch Conv1d + Chomp1d semantics).
# ----------------------------------------------------------------------------
def _ref_causal_conv(x_ncl, w_oik, b, dilation):
    pad = (w_oik.shape[2] - 1) * dilation
    y = lax.conv_general_dilated(
        x_ncl, w_oik, window_strides=(1,), padding=[(pad, 0)],
        rhs_dilation=(dilation,), dimension_numbers=("NCH", "OIH", "NCH"))
    return y + b[None, :, None]


def ref_temporal_conv_net(x_ncl, torch_params, ksize):
    x = x_ncl
    for i, p in enumerate(torch_params):
        d = 2 ** i
        h = jnp.maximum(_ref_causal_conv(x, p["w1"], p["b1"], d), 0.0)
        h = jnp.maximum(_ref_causal_conv(h, p["w2"], p["b2"], d), 0.0)
        res = _ref_causal_conv(x, p["wd"], p["bd"], 1) if "wd" in p else x
        x = jnp.maximum(h + res, 0.0)
    return x


# ----------------------------------------------------------------------------
if __name__ == "__main__":
    key = jax.random.PRNGKey(0)
    N, num_inputs = 2, 4
    num_channels = [8, 8, 16]
    ksize = 2

    key, kx1, kx2 = jax.random.split(key, 3)
    x_small = jax.random.normal(kx1, (N, num_inputs, 16), jnp.float32)
    x_long = jax.random.normal(kx2, (N, num_inputs, 300), jnp.float32)  # >1 tile
    torch_params = init_params(key, num_inputs, num_channels, ksize)

    # f32 compute path: tight verification against the reference
    p_f32 = [prepare_block_params(p, ksize, jnp.float32) for p in torch_params]
    for x_test in (x_small, x_long):
        out = jax.block_until_ready(
            temporal_conv_net(x_test, p_f32, ksize, time_tile=128))
        ref = jax.block_until_ready(
            ref_temporal_conv_net(x_test, torch_params, ksize))
        assert out.shape == (N, num_channels[-1], x_test.shape[2]), out.shape
        assert jnp.allclose(out, ref, atol=2e-4, rtol=2e-4), \
            float(jnp.max(jnp.abs(out - ref)))

    # bf16 compute path (default perf config): loose verification
    p_bf16 = [prepare_block_params(p, ksize, jnp.bfloat16) for p in torch_params]
    out_bf = jax.block_until_ready(
        temporal_conv_net(x_long, p_bf16, ksize, time_tile=128))
    ref_l = ref_temporal_conv_net(x_long, torch_params, ksize)
    assert jnp.allclose(out_bf, ref_l, atol=5e-2, rtol=5e-2), \
        float(jnp.max(jnp.abs(out_bf - ref_l)))

    print("KERNEL_OK")
</pallas_src>

<mosaic_0001>
module attributes {stable_mosaic.version = 11 : i64} {
  func.func @_temporal_block_kernel(%arg0: i32, %arg1: i32, %arg2: memref<1x8x128xf32, #tpu.memory_space<vmem>>, %arg3: memref<1x8x128xf32, #tpu.memory_space<vmem>>, %arg4: memref<8x16xf32, #tpu.memory_space<vmem>>, %arg5: memref<8x1xf32, #tpu.memory_space<vmem>>, %arg6: memref<8x16xf32, #tpu.memory_space<vmem>>, %arg7: memref<8x1xf32, #tpu.memory_space<vmem>>, %arg8: memref<8x8xf32, #tpu.memory_space<vmem>>, %arg9: memref<8x1xf32, #tpu.memory_space<vmem>>, %arg10: memref<1x8x128xf32, #tpu.memory_space<vmem>>) attributes {dimension_semantics = [#tpu.dimension_semantics<parallel>, #tpu.dimension_semantics<parallel>], iteration_bounds = array<i64: 2, 1>, scalar_prefetch = 0 : i64, scratch_operands = 0 : i64, tpu.core_type = #tpu.core_type<tc>, window_params = [{transform_indices = @transform_0, window_bounds = array<i64: 1, 8, 128>}, {transform_indices = @transform_1, window_bounds = array<i64: 1, 8, 128>}, {pipeline_mode = #tpu.pipeline_mode<synchronous>, transform_indices = @transform_2, window_bounds = array<i64: 8, 16>}, {pipeline_mode = #tpu.pipeline_mode<synchronous>, transform_indices = @transform_3, window_bounds = array<i64: 8, 1>}, {pipeline_mode = #tpu.pipeline_mode<synchronous>, transform_indices = @transform_4, window_bounds = array<i64: 8, 16>}, {pipeline_mode = #tpu.pipeline_mode<synchronous>, transform_indices = @transform_5, window_bounds = array<i64: 8, 1>}, {pipeline_mode = #tpu.pipeline_mode<synchronous>, transform_indices = @transform_6, window_bounds = array<i64: 8, 8>}, {pipeline_mode = #tpu.pipeline_mode<synchronous>, transform_indices = @transform_7, window_bounds = array<i64: 8, 1>}, {transform_indices = @transform_8, window_bounds = array<i64: 1, 8, 128>}]} {
    %c0 = arith.constant 0 : index
    %c0_0 = arith.constant 0 : index
    %c0_1 = arith.constant 0 : index
    %0 = vector.load %arg2[%c0, %c0_0, %c0_1] : memref<1x8x128xf32, #tpu.memory_space<vmem>>, vector<1x8x128xf32>
    %1 = vector.shape_cast %0 : vector<1x8x128xf32> to vector<8x128xf32>
    %c0_2 = arith.constant 0 : index
    %c0_3 = arith.constant 0 : index
    %c0_4 = arith.constant 0 : index
    %2 = vector.load %arg3[%c0_2, %c0_3, %c0_4] : memref<1x8x128xf32, #tpu.memory_space<vmem>>, vector<1x8x128xf32>
    %3 = vector.shape_cast %2 : vector<1x8x128xf32> to vector<8x128xf32>
    %4 = vector.extract_strided_slice %3 {offsets = [0, 126], sizes = [8, 2], strides = [1, 1]} : vector<8x128xf32> to vector<8x2xf32>
    %c0_i32 = arith.constant 0 : i32
    %5 = arith.cmpi eq, %arg1, %c0_i32 : i32
    %cst = arith.constant 0.000000e+00 : f32
    %6 = vector.broadcast %cst : f32 to vector<8x2xf32>
    %7 = arith.select %5, %6, %4 : vector<8x2xf32>
    %8 = tpu.concatenate %7, %1 in 1 : vector<8x2xf32>, vector<8x128xf32> -> vector<8x130xf32>
    %9 = vector.extract_strided_slice %8 {offsets = [0, 0], sizes = [8, 129], strides = [1, 1]} : vector<8x130xf32> to vector<8x129xf32>
    %10 = vector.extract_strided_slice %8 {offsets = [0, 1], sizes = [8, 129], strides = [1, 1]} : vector<8x130xf32> to vector<8x129xf32>
    %11 = tpu.concatenate %9, %10 in 0 : vector<8x129xf32>, vector<8x129xf32> -> vector<16x129xf32>
    %c0_5 = arith.constant 0 : index
    %c0_6 = arith.constant 0 : index
    %12 = vector.load %arg4[%c0_5, %c0_6] : memref<8x16xf32, #tpu.memory_space<vmem>>, vector<8x16xf32>
    %cst_7 = arith.constant dense<0.000000e+00> : vector<8x129xf32>
    %13 = tpu.matmul %12, %11, %cst_7 {dimension_numbers = #tpu.dot_dimension_numbers<[1], [0], [0], [1], [0, 0, 1, 1], [], []>} : vector<8x16xf32>, vector<16x129xf32>, vector<8x129xf32> -> vector<8x129xf32>
    %c0_8 = arith.constant 0 : index
    %c0_9 = arith.constant 0 : index
    %14 = vector.load %arg5[%c0_8, %c0_9] : memref<8x1xf32, #tpu.memory_space<vmem>>, vector<8x1xf32>
    %15 = vector.broadcast %14 : vector<8x1xf32> to vector<8x129xf32>
    %16 = arith.addf %13, %15 : vector<8x129xf32>
    %cst_10 = arith.constant 0.000000e+00 : f32
    %17 = vector.broadcast %cst_10 : f32 to vector<8x129xf32>
    %18 = arith.maximumf %16, %17 : vector<8x129xf32>
    %19 = tpu.iota {dimensions = array<i32: 1>} : vector<8x129xi32>
    %c0_i32_11 = arith.constant 0 : i32
    %20 = arith.cmpi eq, %arg1, %c0_i32_11 : i32
    %c1_i32 = arith.constant 1 : i32
    %21 = vector.broadcast %c1_i32 : i32 to vector<8x129xi32>
    %22 = arith.cmpi slt, %19, %21 : vector<8x129xi32>
    %23 = vector.broadcast %20 : i1 to vector<8x129xi1>
    %24 = arith.andi %23, %22 : vector<8x129xi1>
    %cst_12 = arith.constant 0.000000e+00 : f32
    %25 = vector.broadcast %cst_12 : f32 to vector<8x129xf32>
    %26 = arith.select %24, %25, %18 : vector<8x129xi1>, vector<8x129xf32>
    %27 = vector.extract_strided_slice %26 {offsets = [0, 0], sizes = [8, 128], strides = [1, 1]} : vector<8x129xf32> to vector<8x128xf32>
    %28 = vector.extract_strided_slice %26 {offsets = [0, 1], sizes = [8, 128], strides = [1, 1]} : vector<8x129xf32> to vector<8x128xf32>
    %29 = tpu.concatenate %27, %28 in 0 : vector<8x128xf32>, vector<8x128xf32> -> vector<16x128xf32>
    %c0_13 = arith.constant 0 : index
    %c0_14 = arith.constant 0 : index
    %30 = vector.load %arg6[%c0_13, %c0_14] : memref<8x16xf32, #tpu.memory_space<vmem>>, vector<8x16xf32>
    %cst_15 = arith.constant dense<0.000000e+00> : vector<8x128xf32>
    %31 = tpu.matmul %30, %29, %cst_15 {dimension_numbers = #tpu.dot_dimension_numbers<[1], [0], [0], [1], [0, 0, 1, 1], [], []>} : vector<8x16xf32>, vector<16x128xf32>, vector<8x128xf32> -> vector<8x128xf32>
    %c0_16 = arith.constant 0 : index
    %c0_17 = arith.constant 0 : index
    %32 = vector.load %arg7[%c0_16, %c0_17] : memref<8x1xf32, #tpu.memory_space<vmem>>, vector<8x1xf32>
    %33 = vector.broadcast %32 : vector<8x1xf32> to vector<8x128xf32>
    %34 = arith.addf %31, %33 : vector<8x128xf32>
    %cst_18 = arith.constant 0.000000e+00 : f32
    %35 = vector.broadcast %cst_18 : f32 to vector<8x128xf32>
    %36 = arith.maximumf %34, %35 : vector<8x128xf32>
    %c0_19 = arith.constant 0 : index
    %c0_20 = arith.constant 0 : index
    %37 = vector.load %arg8[%c0_19, %c0_20] : memref<8x8xf32, #tpu.memory_space<vmem>>, vector<8x8xf32>
    %cst_21 = arith.constant dense<0.000000e+00> : vector<8x128xf32>
    %38 = tpu.matmul %37, %1, %cst_21 {dimension_numbers = #tpu.dot_dimension_numbers<[1], [0], [0], [1], [0, 0, 1, 1], [], []>} : vector<8x8xf32>, vector<8x128xf32>, vector<8x128xf32> -> vector<8x128xf32>
    %c0_22 = arith.constant 0 : index
    %c0_23 = arith.constant 0 : index
    %39 = vector.load %arg9[%c0_22, %c0_23] : memref<8x1xf32, #tpu.memory_space<vmem>>, vector<8x1xf32>
    %40 = vector.broadcast %39 : vector<8x1xf32> to vector<8x128xf32>
    %41 = arith.addf %38, %40 : vector<8x128xf32>
    %42 = arith.addf %36, %41 : vector<8x128xf32>
    %cst_24 = arith.constant 0.000000e+00 : f32
    %43 = vector.broadcast %cst_24 : f32 to vector<8x128xf32>
    %44 = arith.maximumf %42, %43 : vector<8x128xf32>
    %c0_25 = arith.constant 0 : index
    %c0_26 = arith.constant 0 : index
    %c0_27 = arith.constant 0 : index
    %45 = vector.load %arg10[%c0_25, %c0_26, %c0_27] : memref<1x8x128xf32, #tpu.memory_space<vmem>>, vector<1x8x128xf32>
    %46 = vector.shape_cast %45 : vector<1x8x128xf32> to vector<8x128xf32>
    %47 = vector.shape_cast %44 : vector<8x128xf32> to vector<1x8x128xf32>
    tpu.vector_store %arg10[%c0_25, %c0_26, %c0_27], %47 {strides = array<i32>} : memref<1x8x128xf32, #tpu.memory_space<vmem>>, vector<1x8x128xf32>,
    return
  }
  func.func @transform_0(%arg0: i32, %arg1: i32) -> (i32, i32, i32) {
    %c0_i32 = arith.constant 0 : i32
    %c0_i32_0 = arith.constant 0 : i32
    return %arg0, %c0_i32, %arg1 : i32, i32, i32
  }
  func.func @transform_1(%arg0: i32, %arg1: i32) -> (i32, i32, i32) {
    %c1_i32 = arith.constant 1 : i32
    %0 = arith.subi %arg1, %c1_i32 : i32
    %c0_i32 = arith.constant 0 : i32
    %1 = arith.maxsi %0, %c0_i32 : i32
    %c0_i32_0 = arith.constant 0 : i32
    %c0_i32_1 = arith.constant 0 : i32
    return %arg0, %c0_i32_0, %1 : i32, i32, i32
  }
  func.func @transform_2(%arg0: i32, %arg1: i32) -> (i32, i32) {
    %c0_i32 = arith.constant 0 : i32
    %c0_i32_0 = arith.constant 0 : i32
    %c0_i32_1 = arith.constant 0 : i32
    return %c0_i32, %c0_i32_0 : i32, i32
  }
  func.func @transform_3(%arg0: i32, %arg1: i32) -> (i32, i32) {
    %c0_i32 = arith.constant 0 : i32
    %c0_i32_0 = arith.constant 0 : i32
    %c0_i32_1 = arith.constant 0 : i32
    return %c0_i32, %c0_i32_0 : i32, i32
  }
  func.func @transform_4(%arg0: i32, %arg1: i32) -> (i32, i32) {
    %c0_i32 = arith.constant 0 : i32
    %c0_i32_0 = arith.constant 0 : i32
    %c0_i32_1 = arith.constant 0 : i32
    return %c0_i32, %c0_i32_0 : i32, i32
  }
  func.func @transform_5(%arg0: i32, %arg1: i32) -> (i32, i32) {
    %c0_i32 = arith.constant 0 : i32
    %c0_i32_0 = arith.constant 0 : i32
    %c0_i32_1 = arith.constant 0 : i32
    return %c0_i32, %c0_i32_0 : i32, i32
  }
  func.func @transform_6(%arg0: i32, %arg1: i32) -> (i32, i32) {
    %c0_i32 = arith.constant 0 : i32
    %c0_i32_0 = arith.constant 0 : i32
    %c0_i32_1 = arith.constant 0 : i32
    return %c0_i32, %c0_i32_0 : i32, i32
  }
  func.func @transform_7(%arg0: i32, %arg1: i32) -> (i32, i32) {
    %c0_i32 = arith.constant 0 : i32
    %c0_i32_0 = arith.constant 0 : i32
    %c0_i32_1 = arith.constant 0 : i32
    return %c0_i32, %c0_i32_0 : i32, i32
  }
  func.func @transform_8(%arg0: i32, %arg1: i32) -> (i32, i32, i32) {
    %c0_i32 = arith.constant 0 : i32
    %c0_i32_0 = arith.constant 0 : i32
    return %arg0, %c0_i32, %arg1 : i32, i32, i32
  }
}

</mosaic_0001>

<bundles_post_ra>
// kernel: tpu_custom_call.1
= control target key start
LH: loop header
LB: loop body
LE: loop exit
PB: predicated region body
PF: predicated region fallthrough
CT: control target
= control target key end

     0   :  { %13 = vsyncpa [#allocation3], 0  ;;  %s1281_s0 = inlined_call_operand.vmem [shape: f32[2,8,128], index: 0, kind: input, shape index: {}]   ;;  %s1282_s1 = inlined_call_operand.hbm [shape: f32[2,8,128], index: 1, kind: input, shape index: {}]   ;;  %s1283_s2 = inlined_call_operand.vmem [shape: f32[8,16], index: 2, kind: input, shape index: {}]   ;;  %s1284_s3 = inlined_call_operand.vmem [shape: f32[8,1], index: 3, kind: input, shape index: {}]   ;;  %s1285_s4 = inlined_call_operand.vmem [shape: f32[8,16], index: 4, kind: input, shape index: {}]   ;;  %s1286_s5 = inlined_call_operand.vmem [shape: f32[8,1], index: 5, kind: input, shape index: {}]   ;;  %s1287_s6 = inlined_call_operand.vmem [shape: f32[8,8], index: 6, kind: input, shape index: {}]   ;;  %s1288_s7 = inlined_call_operand.vmem [shape: f32[8,1], index: 7, kind: input, shape index: {}]   ;;  %s1289_s8 = inlined_call_operand.hbm [shape: f32[2,8,128], index: 8, kind: output, shape index: {}]  }
   0x1   :  { %15 = vsyncpa [#allocation3 + $0x1], 0 }
   0x2   :  { %16 = vsyncpa [#allocation4], 0 }
   0x3   :  { %18 = vsyncpa [#allocation4 + $0x1], 0  ;;  %s1078_s27 = smov 0   ;;  %s1080_s28 = smov 0  }
   0x4   :  { %s1082_s29 = smov 0   ;;  %s1084_s30 = smov 0  }
   0x5   :  { %s1086_s9 = smov 0   ;;  %s1088_s10 = smov 0  }
   0x6 LB: > { %s780_s11 = sadd.s32 4294967295, %s1022_s10   ;;  %s781_s12 = sadd.s32 4294967294, %s1022_s10   ;;  %s1022_s10 = sphi %s1088_s10, %s24_s10   ;;  %s1018_s9 = sphi %s1086_s9, %s1305_s9   ;;  %s1014_s30 = sphi %s1084_s30, %s1304_s30   ;;  %s1010_s29 = sphi %s1082_s29, %s1303_s29   ;;  %s1006_s28 = sphi %s1080_s28, %s1302_s28   ;;  %s1002_s27 = sphi %s1078_s27, %s1301_s27  }
   0x7   : > { %s36_s13 = sadd.s32 1, %s1018_s9  ;;  %s79_s14 = sadd.s32 1, %s1010_s29 }
   0x8   : > { %p38_p0 = scmp.ge.s32.totalorder %s36_s13, 2  ;;  %p86_p1 = scmp.ne.s32.totalorder %s1010_s29, %s1006_s28 }
   0x9   : > { %p87_p2 = scmp.eq.s32.totalorder %s1022_s10, 0  ;;  %p92_p3 = scmp.ne.s32.totalorder %s1006_s28, %s1002_s27 }
   0xa   : > { %s1307_s13 = smov (%p38_p0, %s36_s13), 0  ;;  %p93_p5 = scmp.eq.s32.totalorder %s780_s11, 0 }
   0xb   : > { %p1119_p4 = por %p87_p2, %p86_p1  ;;  %s74_s16 = ssub.s32 %s1018_s9, %s1307_s13 }
   0xc   : > { %p244_p6 = scmp.eq.s32.totalorder %s780_s11, 1  ;;  %p77_p7 = scmp.eq.s32.totalorder %s74_s16, 0 }
   0xd   : > { %p1125_p8 = por %p93_p5, %p92_p3  ;;  %p250_p10 = scmp.eq.s32.totalorder %s781_s12, 1 }
   0xe   : > { %p1129_p9 = por %p244_p6, %p86_p1  ;;  %p836_p13 = scmp.lt.s32.totalorder %s1022_s10, 2 }
   0xf   : > { %s1134_s19 = scalar_select %p77_p7, %s1010_s29, %s79_s14  }
  0x10   : > { %s1293_s18 = scalar_select %p1129_p9, 1, 0 }
  0x11   : > { %p1136_p11 = por %p250_p10, %p92_p3  ;;  %s298_s21 = sand.u32 1, %s1010_s29  }
  0x12   : > { %s784_s22 = sshll.u32 %s298_s21, 3  ;;  %s785_s23 = sshll.u32 %s1018_s9, 7 }
  0x13   : > { %s1294_s20 = scalar_select %p1136_p11, 1, 0 }
  0x14   : > { %s1147_s26 = scalar_lea.hbm %s1282_s1, %s785_s23  ;;  %s302_s11 = scalar_lea.vmem [#allocation2], %s784_s22 }
  0x15   : > { %s313_s12 = sshll.u32 %s302_s11, 4  ;;  %p1153_p0 = pnand %p836_p13, %p1119_p4  ;;  %s1149_s12 = int_to_ptr.vmem [resolvable:$true] %s313_s12 }
  0x16   : > { %s299_s16 = scalar_lea.sflag [#allocation3], %s298_s21  ;;  %s910_s23 = scalar_lea.hbm %s1147_s26, 128 }
  0x17   : > { %p911_p3 = scmp.ne.s32.totalorder %s1147_s26, %s910_s23  ;;  %p912_p5 = pneg %p1153_p0 }
  0x18   : > { %s915_s15 = scalar_lea.hbm %s1282_s1, 256  ;;  %p916_p4 = scmp.lt.u32.totalorder %s1147_s26, %s1282_s1 }
  0x19   : > { %p913_p6 = pnand %p912_p5, %p911_p3  ;;  %p917_p10 = scmp.lt.u32.totalorder %s915_s15, %s910_s23 }
  0x1a   : > { %p919_p12 = scmp.lt.u32.totalorder %s910_s23, %s1147_s26 }
  0x1b   : > { %p914_p7 = pneg %p913_p6  ;;  %p918_p13 = por %p917_p10, %p916_p4 }
  0x1d   : > { %p920_p1 = por %p919_p12, %p918_p13 }
  0x1f   : > { %p921_p2 = pnand %p920_p1, %p914_p7 }
  0x21   : > { %924 = shalt.err (!%p921_p2)
}
  0x22   : > { %s925_s21 = scalar_lea.vmem %s1149_s12, 128  ;;  %s1024_s22 = smov [#allocation2]  }
  0x23   : > { %p926_p3 = scmp.ne.s32.totalorder %s1149_s12, %s925_s21  ;;  %s930_s24 = sshll.u32 %s1024_s22, 4  ;;  %s931_s24 = int_to_ptr.vmem [resolvable:$false] %s930_s24 }
  0x24   : > { %s932_s25 = scalar_lea.vmem %s931_s24, 256  ;;  %p933_p9 = scmp.lt.s32.totalorder %s1149_s12, %s931_s24 }
  0x25   : > { %p928_p6 = pnand %p926_p3, %p912_p5  ;;  %p934_p4 = scmp.lt.s32.totalorder %s932_s25, %s925_s21 }
  0x27   : > { %p929_p11 = pneg %p928_p6  ;;  %p935_p10 = por %p934_p4, %p933_p9 }
  0x29   : > { %p936_p12 = pnand %p935_p10, %p929_p11 }
  0x2b   : > { %939 = shalt.err (!%p936_p12)
}
  0x2c   : > { %831 = dma.hbm_to_vmem [thread:$0]  (!%p1153_p0), %s1147_s26, 128, %s1149_s12, %s299_s16  }
  0x2d   : > { %p1296_p1 = scmp.lt.s32.totalorder %s1022_s10, 3  ;;  %p1297_p2 = scmp.ge.s32.totalorder %s1022_s10, 1 }
  0x2f   : > { %p319_p5 = pnand %p1297_p2, %p1296_p1 }
  0x30   : > { %s1189_s23 = sand.u32 (!%p319_p5), 1, %s1006_s28  }
  0x31   : > { %322 = sbr.rel (%p319_p5) target bundleno = 885 (0x375), region = 52  ;;  %s325_s15 = scalar_lea.sflag (!%p319_p5), [#allocation3], %s1189_s23 }
  0x38   : > { %993 = dma.done.wait (%p1125_p8), %s325_s15, 128  }
  0x39   : > { %995 = vsyncadd (%p1125_p8), %s325_s15, 4294967168  ;;  %p368_p9 = scmp.lt.s32.totalorder %s1014_s30, 1  ;;  %v1025_v0 = vmov 0.0   ;;  %s1026_s21 = smov 2   ;;  %vm393_vm0 = vcmask 15360   ;;  %v405_v6 = vld [vmem:[%s1284_s3] sm:$0xff]  ;;  %v488_v18 = vlaneseq }
  0x3a   : > { %479 = vmatprep.mubr.f32.mxu0 %v1025_v0  ;;  %v1027_v7 = vmov 0   ;;  %vm1028_vm1 = vmmov 0   ;;  %s1029_s24 = smov 127   ;;  %vm400_vm2 = vcmask 1039360   ;;  %v404_v16 = vld [vmem:[%s1283_s2] sm:$0xff]  ;;  %vm411_vm3 = vcmask 130048  }
  0x3b   : > { %s369_s26 = scalar_select %p368_p9, %s1014_s30, 1  ;;  %903 = vset.pattern.permute.xlu1 %v1027_v7  ;;  %909 = vset.pattern.permute.xlu0 %v1027_v7  ;;  %v586_v17 = vld [vmem:[%s1287_s6] sm:$0xff]  ;;  %vm593_vm4 = vcmask 64512   ;;  %v1030_v19 = vmov 0.0|0.0   ;;  %v489_v21 = vand.u32 127, %v488_v18  ;;  %vm1031_vm7 = vmmov 1  }
  0x3c   : > { %408 = vperm.xlu1 %903, %v405_v6   ;;  %808 = vmatprep.mubr.msk.f32.mxu1 %vm1028_vm1, %v1025_v0  ;;  %v587_v32 = vld [vmem:[%s1288_s7] sm:$0xff]  ;;  %s796_s25 = sshll.u32 %s1014_s30, 7  ;;  %p1298_p11 = scmp.ne.s32.totalorder %s1293_s18, 0 }
  0x3d   : > { %s789_s12 = sshll.u32 %s369_s26, 3  ;;  %820 = vmatprep.subr.bf16.mxu1 %v1030_v19  ;;  %vm491_vm5 = vcmp.lt.s32.totalorder %v489_v21, 1  ;;  %v506_v33 = vld [vmem:[%s1286_s5] sm:$0xff]  ;;  %s1232_s16 = scalar_lea.hbm %s1289_s8, %s796_s25 }
  0x3e   : > { %s374_s11 = scalar_lea.vmem %s1281_s0, %s789_s12  ;;  %vm791_vm6 = vmneg %vm491_vm5  ;;  %v505_v39 = vld [vmem:[%s1285_s4] sm:$0xff]  ;;  %s1032_s30 = smov [#allocation5]  }
  0x3f   : > { %v378_v1 = vld [vmem:[%s374_s11] sm:$0xff]  ;;  %vm822_vm8 = vmpackc.low %vm1031_vm7, %vm791_vm6  ;;  %s671_s11 = scalar_lea.sflag [#allocation4], %s1189_s23  ;;  %s944_s17 = sshll.u32 %s1032_s30, 4  ;;  %s945_s17 = int_to_ptr.vmem [resolvable:$false] %s944_s17 }
  0x40   : > { %v893_v2 = vpack.i.bf16 %v378_v1, %v1025_v0  ;;  %s946_s22 = scalar_lea.vmem %s945_s17, 256 }
  0x42   : > { %894 = vrot.lane.b32.xlu0 %v893_v2, %s1026_s21 }
  0xb4   : > { %v895_v3 = vpop.permute.xlu0 %894 }
  0xb5   : > { %v897_v4 = vunpack.i.h.bf16 %v895_v3  ;;  %v896_v5 = vunpack.i.l.bf16 %v895_v3 }
  0xb7   : > { %v394_v8 = vsel %vm393_vm0, %v896_v5, %v897_v4 }
  0xb8   : > { %v898_v9 = vpack.i.bf16 %v897_v4, %v394_v8 }
  0xba   : > { %899 = vrot.lane.b32.xlu0 %v898_v9, %s1029_s24 }
  0xbb   : > { %v409_v20 = vpop.permute.xlu1 %408 }
  0xbe   : > { %509 = vperm.xlu0 %909, %v506_v33  }
 0x12c   : > { %v900_v10 = vpop.permute.xlu0 %899 }
 0x12d   : > { %v902_v11 = vunpack.i.h.bf16 %v900_v10  ;;  %v901_v12 = vunpack.i.l.bf16 %v900_v10 }
 0x12f   : > { %v816_v13 = vpack.c.bf16 %v902_v11, %v897_v4  ;;  %v401_v14 = vsel %vm400_vm2, %v901_v12, %v902_v11 }
 0x130   : > { %v818_v15 = vpack.c.bf16 %v401_v14, %v394_v8 }
 0x131   : > { %817 = vmatprep.subr.bf16.mxu0 %v816_v13 }
 0x132   : > { %819 = vmatpush1.bf16.msra.mxu0 %v818_v15 }
 0x133   : > { %811 = vmatprep.subr.mxu0 %v1025_v0 }
 0x135   : > { %790 = vmatmul.mubr.msk.f32.vlgmr.msra.gmra.mrb[0].mxu0 %vm411_vm3, %v404_v16 }
 0x136   : > { %812 = vmatpush3.msra.mxu0 %v378_v1  ;;  %813 = vmatprep.mubr.msk.f32.mxu0 %vm1028_vm1, %v1025_v0 }
 0x139   : > { %814 = vmatmul.mubr.msk.f32.vlgmr.msra.gmra.mrb[2].mxu0 %vm593_vm4, %v586_v17 }
 0x13d   : > { %v510_v40 = vpop.permute.xlu0 %509 }
 0x208   : > { %v481_v22 = vpop.f32.mrb[0].mxu0 }
 0x209   : > { %v482_v23 = vadd.f32 %v481_v22, %v409_v20  ;;  %v483_v24 = vpop.f32.mrb[1].mxu0 }
 0x20a   : > { %v484_v25 = vadd.f32 %v483_v24, %v409_v20 }
 0x20b   : > { %v486_v26 = vmax.f32 %v482_v23, 0.0 }
 0x20c   : > { %v487_v27 = vmax.f32 %v484_v25, 0.0  ;;  %v663_v28 = vpop.f32.mrb[2].mxu0 }
 0x20d   : > { %v495_v29 = vsel %vm491_vm5, 0.0, %v486_v26  ;;  %v815_v30 = vpop.f32.mrb[3].mxu0 }
 0x20e   : > { %v904_v31 = vpack.i.bf16 %v487_v27, %v495_v29 }
 0x210   : > { %905 = vrot.lane.b32.xlu1 %v904_v31, %s1029_s24  ;;  %s788_s24 = sshll.u32 %s1189_s23, 3 }
 0x211   : > { %s367_s15 = scalar_lea.vmem [#allocation5], %s788_s24 }
 0x212   : > { %s685_s26 = sshll.u32 %s367_s15, 4  ;;  %s1234_s26 = int_to_ptr.vmem [resolvable:$true] %s685_s26 }
 0x213   : > { %s940_s21 = scalar_lea.vmem %s1234_s26, 128  ;;  %p947_p13 = scmp.lt.s32.totalorder %s1234_s26, %s945_s17 }
 0x214   : > { %590 = vperm.xlu1 %903, %v587_v32   ;;  %p941_p8 = scmp.ne.s32.totalorder %s1234_s26, %s940_s21  ;;  %p948_p3 = scmp.lt.s32.totalorder %s946_s22, %s940_s21 }
 0x216   : > { %p942_p0 = pnand %p941_p8, %p1298_p11  ;;  %p949_p6 = por %p948_p3, %p947_p13 }
 0x218   : > { %p943_p7 = pneg %p942_p0 }
 0x21a   : > { %p950_p4 = pnand %p949_p6, %p943_p7 }
 0x282   : > { %v906_v34 = vpop.permute.xlu1 %905 }
 0x283   : > { %v908_v35 = vunpack.i.h.bf16 %v906_v34  ;;  %v907_v36 = vunpack.i.l.bf16 %v906_v34 }
 0x285   : > { %v503_v37 = vsel %vm400_vm2, %v907_v36, %v908_v35 }
 0x286   : > { %v821_v38 = vpack.c.bf16 %v503_v37, %v486_v26 }
 0x288   : > { %823 = vmatpush3.bf16.msk.msra.mxu1 %vm822_vm8, %v821_v38 }
 0x28b   : > { %809 = vmatmul.mubr.msk.f32.vlgmr.msra.gmra.mrb[0].mxu1 %vm411_vm3, %v505_v39 }
 0x293   : > { %v591_v41 = vpop.permute.xlu1 %590 }
 0x294   : > { %v664_v45 = vadd.f32 %v663_v28, %v591_v41 }
 0x35e   : > { %v581_v42 = vpop.f32.mrb[0].mxu1 }
 0x35f   : > { %v582_v43 = vadd.f32 %v581_v42, %v510_v40  ;;  %v810_v44 = vpop.f32.mrb[1].mxu1 }
 0x361   : > { %v585_v46 = vmax.f32 %v582_v43, 0.0 }
 0x363   : > { %v667_v47 = vadd.f32 %v664_v45, %v585_v46 }
 0x365   : > { %v668_v48 = vmax.f32 %v667_v47, 0.0 }
 0x367   : > { %669 = vst [vmem:[%s367_s15] sm:$0xff] %v668_v48 }
 0x368   : > { %953 = shalt.err (!%p950_p4)
}
 0x369   : > { %s954_s23 = scalar_lea.hbm %s1232_s16, 128  ;;  %s958_s15 = scalar_lea.hbm %s1289_s8, 256 }
 0x36a   : > { %p955_p10 = scmp.ne.s32.totalorder %s1232_s16, %s954_s23  ;;  %p959_p2 = scmp.lt.u32.totalorder %s1232_s16, %s1289_s8 }
 0x36b   : > { %p960_p5 = scmp.lt.u32.totalorder %s958_s15, %s954_s23  ;;  %p962_p8 = scmp.lt.u32.totalorder %s954_s23, %s1232_s16 }
 0x36c   : > { %p956_p12 = pnand %p955_p10, %p1298_p11 }
 0x36d   : > { %p961_p9 = por %p960_p5, %p959_p2 }
 0x36e   : > { %p957_p1 = pneg %p956_p12 }
 0x36f   : > { %p963_p0 = por %p962_p8, %p961_p9 }
 0x371   : > { %p964_p7 = pnand %p963_p0, %p957_p1 }
 0x373   : > { %967 = shalt.err (!%p964_p7)
}
 0x374   : > { %826 = dma.vmem_to_hbm [thread:$0]  (%p1298_p11), %s1234_s26, 128, %s1232_s16, %s671_s11  }
 0x375 PF: > { %s697_s21 = sand.u32 1, %s1002_s27   ;;  %p1299_p13 = scmp.ne.s32.totalorder %s1294_s20, 0 }
 0x376   : > { %p1300_p3 = scmp.ge.s32.totalorder %s1022_s10, 2  ;;  %s698_s30 = scalar_lea.sflag [#allocation4], %s697_s21 }
 0x378   : > { %p833_p6 = pnand %p1300_p3, %p1299_p13 }
 0x37a   : > { %997 = dma.done.wait (!%p833_p6), %s698_s30, 128  }
 0x37b   : > { %999 = vsyncadd (!%p833_p6), %s698_s30, 4294967168  ;;  %s24_s10 = sadd.s32 1, %s1022_s10   ;;  %s1301_s27 = smov %s1006_s28 }
 0x37c   : > { %p21_p4 = scmp.ge.s32.totalorder %s24_s10, 4   ;;  %s1302_s28 = smov %s1010_s29 }
 0x37d   : > { %s1303_s29 = smov %s1134_s19  ;;  %s1304_s30 = smov %s1018_s9 }
 0x37e   : > { %s1305_s9 = smov %s1307_s13  ;;  %23 = sbr.rel (!%p21_p4) target bundleno = 6 (0x6), region = 100 }
 0x385   :  { %703 = vsyncpa [#allocation3], 1 }
 0x386   :  { %705 = vsyncpa [#allocation3 + $0x1], 1 }
 0x387   :  { %706 = vsyncpa [#allocation4], 1 }
 0x388   :  { %708 = vsyncpa [#allocation4 + $0x1], 1 }

</bundles_post_ra>
